<compile_context>
chip_gen: v6e
topology: v6e:2x2x1
jax: 0.10.0
libtpu: 0.0.40
codegen_flags: <defaults>
</compile_context>

<pallas_src>
import jax
import jax.numpy as jnp
from jax.experimental import pallas as pl
from jax.experimental.pallas import tpu as pltpu


def _code_sim_head_kernel(u_ref, v_ref, wp_ref, bp_ref, wc_ref, bc_ref, out_ref):
    # u_ref / v_ref : [TB, H] CLS-token hidden states for the two code snippets.
    # wp_ref        : [H, H] bf16 pooler weight (in, out).
    # bp_ref        : [1, H] f32, wc_ref: [3, H] bf16, bc_ref: [1, 1] f32.
    tb = u_ref.shape[0]

    # Fuse the two BertPooler matmuls into ONE [2*TB, H] @ [H, H] MXU call.
    # MXU fed bf16, f32 accumulation; bias/tanh stay f32.
    x2 = jnp.concatenate([u_ref[...], v_ref[...]], axis=0).astype(jnp.bfloat16)
    acc = jnp.dot(x2, wp_ref[...], preferred_element_type=jnp.float32)     # [2TB, H]
    pooled = jnp.tanh(acc + bp_ref[...])                                    # [2TB, H] f32
    pu = pooled[:tb]                                                        # [TB, H]
    pv = pooled[tb:]                                                        # [TB, H]
    diff = jnp.abs(pu - pv)                                                 # [TB, H]

    # Linear(3H -> 1) on concat([u, v, |u-v|]) as a VPU multiply + lane reduce
    # (avoids three N=1 MXU push/drain latencies). Head math in f32.
    wc = wc_ref[...].astype(jnp.float32)                                    # [3, H]
    head = pu * wc[0:1, :] + pv * wc[1:2, :] + diff * wc[2:3, :]            # [TB, H]
    logits = jnp.sum(head, axis=-1, keepdims=True) + bc_ref[...]            # [TB, 1]
    out_ref[...] = logits.astype(out_ref.dtype)


def _round_up(x, m):
    return ((x + m - 1) // m) * m


def _resident_spec(shape):
    """Constant-index weight block: single-buffered (it never changes across the grid)."""
    index_map = lambda i: (0,) * len(shape)
    try:
        return pl.BlockSpec(shape, index_map, pipeline_mode=pl.Buffered(1))
    except Exception:  # older jax without pipeline_mode / Buffered(1): plain double-buffer
        return pl.BlockSpec(shape, index_map)


def code_sim_sbert_linear_cls(hidden_u, hidden_v, w_pool, b_pool, w_cls, b_cls):
    """hidden_u/hidden_v: [B, S, H] BERT last_hidden_state for the two inputs.
    w_pool: [H, H] (in, out), b_pool: [H]
    w_cls : [3H, 1] (torch cls.weight transposed), b_cls: [1]
    Returns logits [B, 1] (float32)."""
    B, S, H = hidden_u.shape
    in_dtype = hidden_u.dtype

    # Read the CLS token straight out of the hidden states: view as (B, S*H)
    # (free reshape of a contiguous array) and let the BlockSpec take column
    # block 0 of width H -> only the strided [B, H] CLS rows ever reach VMEM.
    if H % 128 == 0 and S > 1:
        u_in = hidden_u.reshape(B, S * H)
        v_in = hidden_v.reshape(B, S * H)
    else:
        # Lane-unaligned H (non-standard BERT config): fall back to a wrapper slice.
        u_in = hidden_u[:, 0, :]
        v_in = hidden_v[:, 0, :]

    # Batch tiling: sublane-aligned tiles, >= 2 grid steps once B > 8 so both
    # TensorCores (v7x megacore) get work, capped at 512 rows (2*TB <= 1024
    # keeps the MXU pipeline full without blowing VMEM).
    if B <= 8:
        TB = B
    else:
        TB = min(512, _round_up(pl.cdiv(B, 2), 8))
    grid = (pl.cdiv(B, TB),)

    # Parameters: MXU operands in bf16 (halves HBM + resident VMEM), biases f32.
    wp = w_pool.astype(jnp.bfloat16)                       # [H, H]
    wc_rows = w_cls.reshape(3, H).astype(jnp.bfloat16)     # rows [wcu; wcv; wcd]
    bp2 = b_pool.reshape(1, H).astype(jnp.float32)
    bc2 = b_cls.reshape(1, 1).astype(jnp.float32)

    # Explicit VMEM budget: u/v tiles double-buffered, Wp single-buffered (bf16),
    # generous allowance for f32 temporaries (x2 / pooled / head).
    est = (2 * 2 * TB * H * in_dtype.itemsize
           + H * H * 2
           + 32 * TB * H
           + (1 << 20))
    vmem_limit = int(min(48 * 1024 * 1024, max(16 * 1024 * 1024, 2 * est)))

    cost = pl.CostEstimate(
        flops=2 * (2 * B) * H * H + 8 * B * H,             # fused pooler matmul + head
        transcendentals=2 * B * H,                         # tanh
        bytes_accessed=(2 * B * H * in_dtype.itemsize      # strided CLS rows
                        + H * H * 2 + 3 * H * 2            # Wp, Wc (bf16)
                        + (H + 1) * 4                      # biases
                        + B * 4),                          # logits
    )

    return pl.pallas_call(
        _code_sim_head_kernel,
        grid=grid,
        in_specs=[
            pl.BlockSpec((TB, H), lambda i: (i, 0)),   # CLS rows of u (col-block 0)
            pl.BlockSpec((TB, H), lambda i: (i, 0)),   # CLS rows of v
            _resident_spec((H, H)),                    # Wp  (bf16, VMEM-resident)
            _resident_spec((1, H)),                    # bp
            _resident_spec((3, H)),                    # Wc rows
            _resident_spec((1, 1)),                    # bc
        ],
        out_specs=pl.BlockSpec((TB, 1), lambda i: (i, 0)),
        out_shape=jax.ShapeDtypeStruct((B, 1), jnp.float32),
        compiler_params=pltpu.CompilerParams(
            dimension_semantics=("parallel",),
            vmem_limit_bytes=vmem_limit),
        cost_estimate=cost,
    )(u_in, v_in, wp, bp2, wc_rows, bc2)


def _reference(hidden_u, hidden_v, w_pool, b_pool, w_cls, b_cls):
    cls_u = hidden_u[:, 0, :]
    cls_v = hidden_v[:, 0, :]
    pu = jnp.tanh(cls_u @ w_pool + b_pool)
    pv = jnp.tanh(cls_v @ w_pool + b_pool)
    h = jnp.concatenate([pu, pv, jnp.abs(pu - pv)], axis=1)
    return h @ w_cls + b_cls


if __name__ == "__main__":
    # Small but aligned shapes: H a multiple of 128 (like real BERT hidden sizes),
    # B = 16 so the grid has 2 parallel steps and exercises the tiled path.
    B, S, H = 16, 8, 128

    key = jax.random.PRNGKey(0)
    k_hu, k_hv, k_wp, k_bp, k_wc, k_bc = jax.random.split(key, 6)

    # Stand-in BERT encoder outputs (last_hidden_state) for the two code snippets.
    # Attention masks exist in the module's forward but cls_pooling_strat ignores them.
    hidden_u = jax.random.normal(k_hu, (B, S, H), dtype=jnp.float32)
    hidden_v = jax.random.normal(k_hv, (B, S, H), dtype=jnp.float32)

    # Deterministic synthetic parameters (shapes from the module __init__):
    # BertPooler dense: [H, H] + [H]; cls = nn.Linear(3*H, 1): [3H, 1] + [1].
    w_pool = 0.05 * jax.random.normal(k_wp, (H, H), dtype=jnp.float32)
    b_pool = 0.05 * jax.random.normal(k_bp, (H,), dtype=jnp.float32)
    w_cls = 0.05 * jax.random.normal(k_wc, (3 * H, 1), dtype=jnp.float32)
    b_cls = 0.05 * jax.random.normal(k_bc, (1,), dtype=jnp.float32)

    logits = code_sim_sbert_linear_cls(hidden_u, hidden_v,
                                       w_pool, b_pool, w_cls, b_cls)
    logits = jax.block_until_ready(logits)

    ref = _reference(hidden_u, hidden_v, w_pool, b_pool, w_cls, b_cls)
    assert logits.shape == (B, 1)
    err = float(jnp.max(jnp.abs(logits - ref)))
    # bf16 MXU inputs with f32 accumulation -> small, expected deviation vs pure-f32 ref.
    assert err < 5e-2, f"mismatch vs pure-JAX reference: {err}"

    print("KERNEL_OK")
</pallas_src>

<mosaic_0001>
module attributes {stable_mosaic.version = 11 : i64} {
  func.func @_code_sim_head_kernel(%arg0: i32, %arg1: memref<8x128xf32, #tpu.memory_space<vmem>>, %arg2: memref<8x128xf32, #tpu.memory_space<vmem>>, %arg3: memref<128x128xbf16, #tpu.memory_space<vmem>>, %arg4: memref<1x128xf32, #tpu.memory_space<vmem>>, %arg5: memref<3x128xbf16, #tpu.memory_space<vmem>>, %arg6: memref<1x1xf32, #tpu.memory_space<vmem>>, %arg7: memref<8x1xf32, #tpu.memory_space<vmem>>) attributes {dimension_semantics = [#tpu.dimension_semantics<parallel>], iteration_bounds = array<i64: 2>, scalar_prefetch = 0 : i64, scratch_operands = 0 : i64, tpu.core_type = #tpu.core_type<tc>, window_params = [{transform_indices = @transform_0, window_bounds = array<i64: 8, 128>}, {transform_indices = @transform_1, window_bounds = array<i64: 8, 128>}, {pipeline_mode = #tpu.pipeline_mode<synchronous>, transform_indices = @transform_2, window_bounds = array<i64: 128, 128>}, {pipeline_mode = #tpu.pipeline_mode<synchronous>, transform_indices = @transform_3, window_bounds = array<i64: 1, 128>}, {pipeline_mode = #tpu.pipeline_mode<synchronous>, transform_indices = @transform_4, window_bounds = array<i64: 3, 128>}, {pipeline_mode = #tpu.pipeline_mode<synchronous>, transform_indices = @transform_5, window_bounds = array<i64: 1, 1>}, {transform_indices = @transform_6, window_bounds = array<i64: 8, 1>}]} {
    %c0 = arith.constant 0 : index
    %c0_0 = arith.constant 0 : index
    %0 = vector.load %arg1[%c0, %c0_0] : memref<8x128xf32, #tpu.memory_space<vmem>>, vector<8x128xf32>
    %c0_1 = arith.constant 0 : index
    %c0_2 = arith.constant 0 : index
    %1 = vector.load %arg2[%c0_1, %c0_2] : memref<8x128xf32, #tpu.memory_space<vmem>>, vector<8x128xf32>
    %2 = tpu.concatenate %0, %1 in 0 : vector<8x128xf32>, vector<8x128xf32> -> vector<16x128xf32>
    %3 = arith.truncf %2 : vector<16x128xf32> to vector<16x128xbf16>
    %c0_3 = arith.constant 0 : index
    %c0_4 = arith.constant 0 : index
    %4 = vector.load %arg3[%c0_3, %c0_4] : memref<128x128xbf16, #tpu.memory_space<vmem>>, vector<128x128xbf16>
    %cst = arith.constant dense<0.000000e+00> : vector<16x128xf32>
    %5 = tpu.matmul %3, %4, %cst {dimension_numbers = #tpu.dot_dimension_numbers<[1], [0], [0], [1], [0, 0, 1, 1], [], []>} : vector<16x128xbf16>, vector<128x128xbf16>, vector<16x128xf32> -> vector<16x128xf32>
    %c0_5 = arith.constant 0 : index
    %c0_6 = arith.constant 0 : index
    %6 = vector.load %arg4[%c0_5, %c0_6] : memref<1x128xf32, #tpu.memory_space<vmem>>, vector<1x128xf32>
    %7 = vector.broadcast %6 : vector<1x128xf32> to vector<16x128xf32>
    %8 = arith.addf %5, %7 : vector<16x128xf32>
    %9 = math.tanh %8 : vector<16x128xf32>
    %10 = vector.extract_strided_slice %9 {offsets = [0, 0], sizes = [8, 128], strides = [1, 1]} : vector<16x128xf32> to vector<8x128xf32>
    %11 = vector.extract_strided_slice %9 {offsets = [8, 0], sizes = [8, 128], strides = [1, 1]} : vector<16x128xf32> to vector<8x128xf32>
    %12 = arith.subf %10, %11 : vector<8x128xf32>
    %13 = math.absf %12 : vector<8x128xf32>
    %c0_7 = arith.constant 0 : index
    %c0_8 = arith.constant 0 : index
    %14 = vector.load %arg5[%c0_7, %c0_8] : memref<3x128xbf16, #tpu.memory_space<vmem>>, vector<3x128xbf16>
    %15 = arith.extf %14 : vector<3x128xbf16> to vector<3x128xf32>
    %16 = vector.extract_strided_slice %15 {offsets = [0, 0], sizes = [1, 128], strides = [1, 1]} : vector<3x128xf32> to vector<1x128xf32>
    %17 = vector.broadcast %16 : vector<1x128xf32> to vector<8x128xf32>
    %18 = arith.mulf %10, %17 : vector<8x128xf32>
    %19 = vector.extract_strided_slice %15 {offsets = [1, 0], sizes = [1, 128], strides = [1, 1]} : vector<3x128xf32> to vector<1x128xf32>
    %20 = vector.broadcast %19 : vector<1x128xf32> to vector<8x128xf32>
    %21 = arith.mulf %11, %20 : vector<8x128xf32>
    %22 = arith.addf %18, %21 : vector<8x128xf32>
    %23 = vector.extract_strided_slice %15 {offsets = [2, 0], sizes = [1, 128], strides = [1, 1]} : vector<3x128xf32> to vector<1x128xf32>
    %24 = vector.broadcast %23 : vector<1x128xf32> to vector<8x128xf32>
    %25 = arith.mulf %13, %24 : vector<8x128xf32>
    %26 = arith.addf %22, %25 : vector<8x128xf32>
    %cst_9 = arith.constant dense<0.000000e+00> : vector<8xf32>
    %27 = vector.multi_reduction <add>, %26, %cst_9 [1] : vector<8x128xf32> to vector<8xf32>
    %28 = vector.shape_cast %27 : vector<8xf32> to vector<8x1xf32>
    %c0_10 = arith.constant 0 : index
    %c0_11 = arith.constant 0 : index
    %29 = vector.load %arg6[%c0_10, %c0_11] : memref<1x1xf32, #tpu.memory_space<vmem>>, vector<1x1xf32>
    %30 = vector.broadcast %29 : vector<1x1xf32> to vector<8x1xf32>
    %31 = arith.addf %28, %30 : vector<8x1xf32>
    %c0_12 = arith.constant 0 : index
    %c0_13 = arith.constant 0 : index
    %32 = vector.load %arg7[%c0_12, %c0_13] : memref<8x1xf32, #tpu.memory_space<vmem>>, vector<8x1xf32>
    tpu.vector_store %arg7[%c0_12, %c0_13], %31 {strides = array<i32>} : memref<8x1xf32, #tpu.memory_space<vmem>>, vector<8x1xf32>,
    return
  }
  func.func @transform_0(%arg0: i32) -> (i32, i32) {
    %c0_i32 = arith.constant 0 : i32
    %c0_i32_0 = arith.constant 0 : i32
    return %arg0, %c0_i32 : i32, i32
  }
  func.func @transform_1(%arg0: i32) -> (i32, i32) {
    %c0_i32 = arith.constant 0 : i32
    %c0_i32_0 = arith.constant 0 : i32
    return %arg0, %c0_i32 : i32, i32
  }
  func.func @transform_2(%arg0: i32) -> (i32, i32) {
    %c0_i32 = arith.constant 0 : i32
    %c0_i32_0 = arith.constant 0 : i32
    %c0_i32_1 = arith.constant 0 : i32
    return %c0_i32, %c0_i32_0 : i32, i32
  }
  func.func @transform_3(%arg0: i32) -> (i32, i32) {
    %c0_i32 = arith.constant 0 : i32
    %c0_i32_0 = arith.constant 0 : i32
    %c0_i32_1 = arith.constant 0 : i32
    return %c0_i32, %c0_i32_0 : i32, i32
  }
  func.func @transform_4(%arg0: i32) -> (i32, i32) {
    %c0_i32 = arith.constant 0 : i32
    %c0_i32_0 = arith.constant 0 : i32
    %c0_i32_1 = arith.constant 0 : i32
    return %c0_i32, %c0_i32_0 : i32, i32
  }
  func.func @transform_5(%arg0: i32) -> (i32, i32) {
    %c0_i32 = arith.constant 0 : i32
    %c0_i32_0 = arith.constant 0 : i32
    %c0_i32_1 = arith.constant 0 : i32
    return %c0_i32, %c0_i32_0 : i32, i32
  }
  func.func @transform_6(%arg0: i32) -> (i32, i32) {
    %c0_i32 = arith.constant 0 : i32
    %c0_i32_0 = arith.constant 0 : i32
    return %arg0, %c0_i32 : i32, i32
  }
}

</mosaic_0001>

<bundles_post_ra>
// kernel: tpu_custom_call.1
= control target key start
LH: loop header
LB: loop body
LE: loop exit
PB: predicated region body
PF: predicated region fallthrough
CT: control target
= control target key end

     0   :  { %s1048_s0 = inlined_call_operand.hbm [shape: f32[16,1024], index: 0, kind: input, shape index: {}]   ;;  %s1049_s1 = inlined_call_operand.hbm [shape: f32[16,1024], index: 1, kind: input, shape index: {}]   ;;  %s1050_s2 = inlined_call_operand.hbm [shape: bf16[128,128], index: 2, kind: input, shape index: {}]   ;;  %s1051_s3 = inlined_call_operand.vmem [shape: f32[1,128], index: 3, kind: input, shape index: {}]   ;;  %s1052_s4 = inlined_call_operand.vmem [shape: bf16[3,128], index: 4, kind: input, shape index: {}]   ;;  %s1053_s5 = inlined_call_operand.<no memory space> [shape: f32[1,1], index: 5, kind: input, shape index: {}]   ;;  %s1054_s6 = inlined_call_operand.vmem [shape: f32[16,1], index: 6, kind: output, shape index: {}]  }
   0x1   :  { %v11_v0 = vstv %s1053_s5 }
   0x2   :  { %12 = vst [vmem:[#allocation2] sm:$0x1] %v11_v0 }
   0x3   :  { %13 = vsyncpa [#allocation4], 0 }
   0x4   :  { %15 = vsyncpa [#allocation4 + $0x1], 0 }
   0x5   :  { %16 = vsyncpa [#allocation6], 0 }
   0x6   :  { %18 = vsyncpa [#allocation6 + $0x1], 0  ;;  %s870_s23 = smov 0   ;;  %s872_s24 = smov 0  }
   0x7   :  { %s874_s25 = smov 0   ;;  %s876_s26 = smov 0  }
   0x8 LB: > { %s889_s5 = sadd.s32 4294967295, %s823_s26   ;;  %p44_p0 = scmp.ne.s32.totalorder %s815_s24, %s811_s23  ;;  %s823_s26 = sphi %s876_s26, %s1069_s26   ;;  %s819_s25 = sphi %s874_s25, %s1068_s25   ;;  %s815_s24 = sphi %s872_s24, %s1067_s24   ;;  %s811_s23 = sphi %s870_s23, %s1066_s23  }
   0x9   : > { %p1055_p1 = scmp.eq.s32.totalorder %s889_s5, 0  ;;  %p571_p2 = scmp.ge.s32.totalorder %s823_s26, 1 }
   0xa   : > { %p191_p3 = scmp.lt.s32.totalorder %s823_s26, 3  ;;  %s825_s29 = smov [#allocation7]  }
   0xb   : > { %p897_p4 = por %p1055_p1, %p44_p0  ;;  %s203_s30 = sshll.u32 %s825_s29, 4  ;;  %s204_s30 = int_to_ptr.vmem [resolvable:$true] %s203_s30 }
   0xc   : > { %p901_p5 = pnand %p571_p2, %p191_p3  ;;  %s914_s8 = sadd.s32 1, %s823_s26  }
   0xd   : > { %s1058_s27 = scalar_select %p897_p4, 1, 0 }
   0xe   : > { %s1059_s28 = scalar_select %p901_p5, 1, 0 }
   0xf   : > { %p636_p6 = pneg %p901_p5  ;;  %s31_s9 = sadd.s32 1, %s819_s25 }
  0x10   : > { %s28_s10 = ssub.s32 %s823_s26, %s914_s8  ;;  %s710_s11 = scalar_lea.vmem %s204_s30, 1024 }
  0x11   : > { %p909_p7 = pnand %p636_p6, %p1055_p1  ;;  %p711_p9 = scmp.ne.s32.totalorder %s204_s30, %s710_s11 }
  0x12   : > { %p718_p12 = scmp.lt.s32.totalorder %s204_s30, %s204_s30  ;;  %p719_p13 = scmp.lt.s32.totalorder %s710_s11, %s710_s11 }
  0x13   : > { %p701_p8 = pneg %p909_p7 }
  0x14   : > { %p720_p0 = por %p719_p13, %p718_p12 }
  0x15   : > { %p713_p10 = pnand %p711_p9, %p701_p8 }
  0x17   : > { %p714_p11 = pneg %p713_p10 }
  0x19   : > { %p721_p2 = pnand %p720_p0, %p714_p11 }
  0x1b   : > { %724 = shalt.err (!%p721_p2)
}
  0x1c   : > { %s826_s12 = smov 64   ;;  %s827_s13 = smov 4  }
  0x1d   : > { %639 = dma.hbm_to_vmem [thread:$0]  (!%p909_p7), %s1050_s2, 1024, %s204_s30, [#allocation6], %s826_s12, %s826_s12, %s827_s13  }
  0x1e   : > { %p29_p3 = scmp.eq.s32.totalorder %s28_s10, 0  ;;  %p38_p6 = scmp.ne.s32.totalorder %s819_s25, %s815_s24 }
  0x1f   : > { %p39_p8 = scmp.eq.s32.totalorder %s823_s26, 0  ;;  %p648_p9 = scmp.lt.s32.totalorder %s823_s26, 2 }
  0x20   : > { %s931_s16 = scalar_select %p29_p3, %s819_s25, %s31_s9  }
  0x21   : > { %p40_p10 = por %p39_p8, %p38_p6  ;;  %s226_s17 = sand.u32 1, %s819_s25  }
  0x22   : > { %s934_s18 = sshll.u32 %s226_s17, 3  ;;  %s597_s19 = sshll.u32 %s823_s26, 10 }
  0x23   : > { %s940_s22 = scalar_lea.hbm %s1048_s0, %s597_s19  ;;  %s230_s23 = scalar_lea.vmem [#allocation3], %s934_s18 }
  0x24   : > { %s238_s29 = sshll.u32 %s230_s23, 4  ;;  %p945_p7 = pnand %p648_p9, %p40_p10  ;;  %s943_s29 = int_to_ptr.vmem [resolvable:$true] %s238_s29 }
  0x25   : > { %s952_s10 = scalar_lea.hbm %s1049_s1, %s597_s19  ;;  %s245_s11 = sand.u32 1, %s823_s26  }
  0x26   : > { %s227_s12 = scalar_lea.sflag [#allocation4], %s226_s17  ;;  %s725_s13 = scalar_lea.hbm %s940_s22, 128 }
  0x27   : > { %p726_p11 = scmp.ne.s32.totalorder %s940_s22, %s725_s13  ;;  %p727_p12 = pneg %p945_p7 }
  0x28   : > { %s730_s20 = scalar_lea.hbm %s1048_s0, 2048  ;;  %p731_p2 = scmp.lt.s32.totalorder %s940_s22, %s1048_s0 }
  0x29   : > { %p728_p13 = pnand %p727_p12, %p726_p11  ;;  %p732_p3 = scmp.lt.s32.totalorder %s730_s20, %s725_s13 }
  0x2b   : > { %p729_p0 = pneg %p728_p13  ;;  %p733_p6 = por %p732_p3, %p731_p2 }
  0x2d   : > { %p734_p8 = pnand %p733_p6, %p729_p0 }
  0x2f   : > { %737 = shalt.err (!%p734_p8)
}
  0x30   : > { %s738_s17 = scalar_lea.vmem %s943_s29, 128  ;;  %s828_s19 = smov [#allocation3]  }
  0x31   : > { %p739_p9 = scmp.ne.s32.totalorder %s943_s29, %s738_s17  ;;  %s743_s7 = sshll.u32 %s828_s19, 4  ;;  %s744_s7 = int_to_ptr.vmem [resolvable:$false] %s743_s7 }
  0x32   : > { %s745_s9 = scalar_lea.vmem %s744_s7, 256  ;;  %p746_p13 = scmp.lt.s32.totalorder %s943_s29, %s744_s7 }
  0x33   : > { %p741_p10 = pnand %p739_p9, %p727_p12  ;;  %p747_p1 = scmp.lt.s32.totalorder %s745_s9, %s738_s17 }
  0x35   : > { %p742_p11 = pneg %p741_p10  ;;  %p748_p4 = por %p747_p1, %p746_p13 }
  0x37   : > { %p749_p2 = pnand %p748_p4, %p742_p11 }
  0x39   : > { %752 = shalt.err (!%p749_p2)
}
  0x3a   : > { %643 = dma.hbm_to_vmem [thread:$0]  (!%p945_p7), %s940_s22, 128, %s943_s29, %s227_s12  }
  0x3b   : > { %s249_s13 = scalar_lea.vmem [#allocation5], %s934_s18  ;;  %s246_s15 = scalar_lea.sflag [#allocation6], %s245_s11 }
  0x3c   : > { %s257_s14 = sshll.u32 %s249_s13, 4  ;;  %s753_s20 = scalar_lea.hbm %s952_s10, 128  ;;  %s258_s14 = int_to_ptr.vmem [resolvable:$true] %s257_s14 }
  0x3d   : > { %p754_p1 = scmp.ne.s32.totalorder %s952_s10, %s753_s20  ;;  %s758_s17 = scalar_lea.hbm %s1049_s1, 2048 }
  0x3e   : > { %p759_p3 = scmp.lt.s32.totalorder %s952_s10, %s1049_s1  ;;  %p760_p6 = scmp.lt.s32.totalorder %s758_s17, %s753_s20 }
  0x3f   : > { %p756_p4 = pnand %p754_p1, %p727_p12 }
  0x40   : > { %p761_p8 = por %p760_p6, %p759_p3 }
  0x41   : > { %p757_p0 = pneg %p756_p4 }
  0x43   : > { %p762_p9 = pnand %p761_p8, %p757_p0 }
  0x45   : > { %765 = shalt.err (!%p762_p9)
}
  0x46   : > { %s766_s26 = scalar_lea.vmem %s258_s14, 128  ;;  %s829_s18 = smov [#allocation5]  }
  0x47   : > { %p767_p10 = scmp.ne.s32.totalorder %s258_s14, %s766_s26  ;;  %s771_s22 = sshll.u32 %s829_s18, 4  ;;  %s772_s22 = int_to_ptr.vmem [resolvable:$false] %s771_s22 }
  0x48   : > { %s773_s29 = scalar_lea.vmem %s772_s22, 256  ;;  %p774_p2 = scmp.lt.s32.totalorder %s258_s14, %s772_s22 }
  0x49   : > { %p769_p11 = pnand %p767_p10, %p727_p12  ;;  %p775_p1 = scmp.lt.s32.totalorder %s773_s29, %s766_s26 }
  0x4b   : > { %p770_p13 = pneg %p769_p11  ;;  %p776_p4 = por %p775_p1, %p774_p2 }
  0x4d   : > { %p777_p5 = pnand %p776_p4, %p770_p13 }
  0x4f   : > { %780 = shalt.err (!%p777_p5)
}
  0x50   : > { %646 = dma.hbm_to_vmem [thread:$0]  (!%p945_p7), %s952_s10, 128, %s258_s14, %s246_s15  }
  0x51   : > { %p1062_p0 = scmp.ne.s32.totalorder %s1059_s28, 0 }
  0x52   : > { %s268_s11 = sand.u32 (!%p1062_p0), 1, %s815_s24   ;;  %p1063_p12 = scmp.ne.s32.totalorder (!%p1062_p0), %s1058_s27, 0 }
  0x53   : > { %266 = sbr.rel (%p1062_p0) target bundleno = 490 (0x1ea), region = 44  ;;  %s1003_s12 = sshll.u32 (!%p1062_p0), %s268_s11, 3 }
  0x54   : > { %s269_s9 = scalar_lea.sflag (!%p1062_p0), [#allocation4], %s268_s11  ;;  %s272_s13 = scalar_lea.vmem (!%p1062_p0), [#allocation3], %s1003_s12 }
  0x58   : > { %798 = dma.done.wait (%p1063_p12), %s269_s9, 128  }
  0x59   : > { %800 = vsyncadd (%p1063_p12), %s269_s9, 4294967168  ;;  %s277_s30 = sand.u32 1, %s889_s5   ;;  %s281_s28 = scalar_lea.vmem [#allocation5], %s1003_s12 }
  0x5a   : > { %s278_s10 = scalar_lea.sflag [#allocation6], %s277_s30 }
  0x5b   : > { %802 = dma.done.wait (%p1063_p12), %s278_s10, 128  }
  0x5c   : > { %804 = vsyncadd (%p1063_p12), %s278_s10, 4294967168  ;;  %p1064_p5 = scmp.eq.s32.totalorder %s889_s5, 0 }
  0x5e   : > { %806 = dma.done.wait (%p1064_p5), [#allocation6], 1024   ;;  %p1065_p7 = pmov %p1064_p5 }
  0x5f   : > { %v830_v1 = vmov 0.0   ;;  %vm831_vm0 = vmmov 0   ;;  %v687_v2 = vld [vmem:[#allocation7 + $0x38] sm:$0xff]   ;;  %v688_v3 = vld [vmem:[#allocation7 + $0x30] sm:$0xff]   ;;  %v689_v4 = vld [vmem:[#allocation7 + $0x28] sm:$0xff]   ;;  %v444_v20 = vlaneseq  ;;  %p318_p3 = scmp.lt.s32.totalorder %s889_s5, 1 }
  0x60   : > { %808 = vsyncadd (%p1065_p7), [#allocation6], 4294966272  ;;  %608 = vmatprep.subr.bf16.mxu0 %v830_v1  ;;  %624 = vmatprep.mubr.msk.bf16.mxu0 %vm831_vm0, %v830_v1  ;;  %v690_v5 = vld [vmem:[#allocation7 + $0x20] sm:$0xff]   ;;  %v691_v6 = vld [vmem:[#allocation7 + $0x18] sm:$0xff]   ;;  %vm471_vm1 = vcmask 7168  }
  0x61   : > { %609 = vmatpush3.bf16.msra.mxu0 %v687_v2  ;;  %v692_v7 = vld [vmem:[#allocation7 + $0x10] sm:$0xff]   ;;  %v693_v8 = vld [vmem:[#allocation7 + $0x8] sm:$0xff]   ;;  %v694_v9 = vld [vmem:[#allocation7] sm:$0xff]   ;;  %v445_v21 = vshrl.u32 %v444_v20, 7  ;;  %s1071_s5 = smov (!%p318_p3, %s889_s5), 1 }
  0x62   : > { %610 = vmatprep.subr.bf16.mxu0 %v830_v1  ;;  %v323_v10 = vld [vmem:[%s272_s13] sm:$0xff]  ;;  %v324_v11 = vld [vmem:[%s281_s28] sm:$0xff]  ;;  %s584_s21 = sshll.u32 %s1071_s5, 3 }
  0x63   : > { %v325_v12 = vpack.c.bf16 %v324_v11, %v323_v10  ;;  %v585_v13 = vld [vmem:[%s1051_s3] ss:$0 sm:$0xff]  ;;  %v451_v23 = vsub.s32 1, %v445_v21  ;;  %v446_v25 = vsub.s32 0, %v445_v21  ;;  %v457_v27 = vsub.s32 2, %v445_v21  ;;  %s321_s19 = scalar_lea.vmem %s1054_s6, %s584_s21 }
  0x64   : > { %v442_v22 = vld [vmem:[%s1052_s4] sm:$0x3] }
  0x65   : > { %611 = vmatpush3.bf16.msra.mxu0 %v688_v3  ;;  %v443_v24 = vunpack.c.l.bf16 %v442_v22  ;;  %v594_v39 = vld [vmem:[#allocation2] ss:$0 sm:$0xff] }
  0x66   : > { %612 = vmatprep.subr.bf16.mxu0 %v830_v1 }
  0x67   : > { %v452_v26 = vrot.slane %v443_v24, %v451_v23  ;;  %v447_v29 = vrot.slane %v443_v24, %v446_v25  ;;  %v458_v33 = vrot.slane %v443_v24, %v457_v27 }
  0x69   : > { %613 = vmatpush3.bf16.msra.mxu0 %v689_v4 }
  0x6a   : > { %614 = vmatprep.subr.bf16.mxu0 %v830_v1 }
  0x6d   : > { %615 = vmatpush3.bf16.msra.mxu0 %v690_v5 }
  0x6e   : > { %616 = vmatprep.subr.bf16.mxu0 %v830_v1 }
  0x71   : > { %617 = vmatpush3.bf16.msra.mxu0 %v691_v6 }
  0x72   : > { %618 = vmatprep.subr.bf16.mxu0 %v830_v1 }
  0x75   : > { %619 = vmatpush3.bf16.msra.mxu0 %v692_v7 }
  0x76   : > { %620 = vmatprep.subr.bf16.mxu0 %v830_v1 }
  0x79   : > { %621 = vmatpush3.bf16.msra.mxu0 %v693_v8 }
  0x7a   : > { %622 = vmatprep.subr.bf16.mxu0 %v830_v1 }
  0x7d   : > { %623 = vmatpush3.bf16.msra.mxu0 %v694_v9 }
  0x80   : > { %625 = vmatmul.mubr.bf16.vlgmr.msra.gmra.mxu0 %v325_v12 }
 0x140   : > { %v431_v14 = vpop.f32.mrf.mxu0 }
 0x141   : > { %v432_v15 = vadd.f32 %v585_v13, %v431_v14 }
 0x142   : > { %v626_v16 = vpop.f32.mrf.mxu0 }
 0x143   : > { %695 = vtanh.f32 %v432_v15 }
 0x144   : > { %v434_v17 = vpop.f32.mrf.mxu0 }
 0x145   : > { %v435_v18 = vadd.f32 %v585_v13, %v434_v17 }
 0x146   : > { %v627_v19 = vpop.f32.mrf.mxu0 }
 0x147   : > { %697 = vtanh.f32 %v435_v18 }
 0x150   : > { %v696_v28 = vpop.eup %695 }
 0x151   : > { %v448_v35 = vmul.f32 %v696_v28, %v447_v29 }
 0x154   : > { %v698_v30 = vpop.eup %697 }
 0x155   : > { %v440_v31 = vsub.f32 %v696_v28, %v698_v30  ;;  %v453_v32 = vmul.f32 %v698_v30, %v452_v26 }
 0x157   : > { %v441_v34 = vand.u32 2147483647, %v440_v31  ;;  %v454_v36 = vadd.f32 %v453_v32, %v448_v35 }
 0x159   : > { %v459_v37 = vmul.f32 %v458_v33, %v441_v34 }
 0x15b   : > { %v460_v38 = vadd.f32 %v459_v37, %v454_v36 }
 0x15d   : > { %461 = vadd.xlane.f32.xlu0 %v460_v38 }
 0x1e6   : > { %v462_v40 = vpop.xlane.xlu0 %461 }
 0x1e7   : > { %v470_v41 = vadd.f32 %v594_v39, %v462_v40 }
 0x1e9   : > { %472 = vst.msk [vmem:[%s321_s19] sm:$0xff] %vm471_vm1, %v470_v41 }
 0x1ea PF: > { %p21_p6 = scmp.ge.s32.totalorder %s914_s8, 4   ;;  %s1066_s23 = smov %s815_s24 }
 0x1eb   : > { %s1067_s24 = smov %s819_s25  ;;  %s1068_s25 = smov %s931_s16 }
 0x1ec   : > { %s1069_s26 = smov %s914_s8  ;;  %23 = sbr.rel (!%p21_p6) target bundleno = 8 (0x8), region = 101 }
 0x1f1   :  { %492 = vsyncpa [#allocation4], 1 }
 0x1f2   :  { %494 = vsyncpa [#allocation4 + $0x1], 1 }
 0x1f3   :  { %495 = vsyncpa [#allocation6], 1 }
 0x1f4   :  { %497 = vsyncpa [#allocation6 + $0x1], 1 }

</bundles_post_ra>
